<compile_context>
chip_gen: v7x
topology: tpu7x:2x2x1
jax: 0.10.0
libtpu: 0.0.40
codegen_flags: <defaults>
</compile_context>

<pallas_src>
import functools

import numpy as np
import jax
import jax.numpy as jnp
from jax.experimental import pallas as pl
from jax.experimental.pallas import tpu as pltpu


_VMEM_LIMIT_BYTES = 48 * 1024 * 1024   # explicit scoped-VMEM budget (fits all gens)


def _qkv_proj_kernel(x_ref, w_ref, b_ref, qkv_ref):
    # x_ref   (TS, E)    bf16
    # w_ref   (E, 3Hp)   bf16  ([Wq*1/sqrt(H) | Wk | Wv], zero-padded columns)
    # b_ref   (1, 3Hp)   f32   (matching fused bias)
    # qkv_ref (TS, 3Hp)  bf16
    acc = jnp.dot(x_ref[...], w_ref[...], preferred_element_type=jnp.float32)
    qkv_ref[...] = (acc + b_ref[...]).astype(qkv_ref.dtype)


def _attention_kernel(mask_ref, q_ref, k_ref, v_ref, o_ref, *, tq, seq_len, training):
    # Grid: (batch, query-tile).  Refs (batch dim squeezed):
    #   mask_ref (1, S)    int32 of {0, 1}
    #   q_ref    (TQ, Hp)  bf16  (pre-scaled by 1/sqrt(H))
    #   k_ref    (S, Hp)   bf16
    #   v_ref    (S, Hp)   bf16
    #   o_ref    (TQ, Hp)  bf16
    qi = pl.program_id(1)
    q_start = pl.multiple_of(qi * tq, tq)

    # Scores (TQ, S): contract over the head axis directly (no transpose).
    scores = jax.lax.dot_general(
        q_ref[...], k_ref[...],
        dimension_numbers=(((1,), (1,)), ((), ())),
        preferred_element_type=jnp.float32)

    if training:
        # temp_mask[i, j] = mask[j] if j >= global_row(i) else 0
        # Broadcast-shaped iotas: no (TQ, S) int32 temporaries are materialized.
        row_ids = q_start + jax.lax.broadcasted_iota(jnp.int32, (tq, 1), 0)   # (TQ, 1)
        col_ids = jax.lax.broadcasted_iota(jnp.int32, (1, seq_len), 1)        # (1, S)
        keep = (col_ids >= row_ids) & (mask_ref[...] != 0)                    # (TQ, S) bool
        scores = jnp.where(keep, scores, jnp.float32(-1e22))

    # Softmax over keys (f32, max-subtracted); normalization deferred to after
    # the PV matmul so the scale touches (TQ, Hp) instead of (TQ, S).
    scores = scores - jnp.max(scores, axis=-1, keepdims=True)
    p = jnp.exp(scores)
    denom = jnp.sum(p, axis=-1, keepdims=True)                                # (TQ, 1)

    o = jnp.dot(p.astype(jnp.bfloat16), v_ref[...],
                preferred_element_type=jnp.float32)                           # (TQ, Hp)
    o_ref[...] = (o * pl.reciprocal(denom, approx=True)).astype(o_ref.dtype)


def self_attention(x, mask, wq, bq, wk, bk, wv, bv, *,
                   training=True, tq=256, ts=256):
    """x: (B, S, E), mask: (B, S) of {0,1}. Returns (B, S, H) bf16."""
    B, S, E = x.shape
    H = wq.shape[0]

    Hp = ((H + 127) // 128) * 128          # lane-dense head padding
    TQ = min(tq, S)
    TS = min(ts, S)
    assert S % TQ == 0, "sequence length must be divisible by the query tile"
    assert S % TS == 0, "sequence length must be divisible by the projection tile"

    scale = jnp.float32(1.0 / np.sqrt(H))  # folded into the Q projection

    def pad_w(w):                          # (H, E) torch-Linear weight -> (E, Hp) f32
        wt = jnp.asarray(w, jnp.float32).T
        return jnp.pad(wt, ((0, 0), (0, Hp - H)))

    def pad_b(b):                          # (H,) -> (Hp,) f32
        return jnp.pad(jnp.asarray(b, jnp.float32), (0, Hp - H))

    # Fused projection weight [Wq*scale | Wk | Wv] and bias.
    w_qkv = jnp.concatenate([pad_w(wq) * scale, pad_w(wk), pad_w(wv)],
                            axis=1).astype(jnp.bfloat16)                 # (E, 3Hp)
    b_qkv = jnp.concatenate([pad_b(bq) * scale, pad_b(bk), pad_b(bv)])[None, :]  # (1, 3Hp)

    x_bf = x.astype(jnp.bfloat16)
    mask3 = mask.astype(jnp.int32)[:, None, :]                           # (B, 1, S)

    wmap = lambda b, i: (0, 0)             # whole-array weight/bias blocks

    # --- 1) QKV projection: computed once per sequence element ------------
    qkv = pl.pallas_call(
        _qkv_proj_kernel,
        out_shape=jax.ShapeDtypeStruct((B, S, 3 * Hp), jnp.bfloat16),
        grid_spec=pltpu.PrefetchScalarGridSpec(
            num_scalar_prefetch=0,
            grid=(B, S // TS),
            in_specs=[
                pl.BlockSpec((pl.Squeezed(), TS, E), lambda b, si: (b, si, 0)),  # x tile
                pl.BlockSpec((E, 3 * Hp), wmap),                                 # fused W
                pl.BlockSpec((1, 3 * Hp), wmap),                                 # fused b
            ],
            out_specs=pl.BlockSpec((pl.Squeezed(), TS, 3 * Hp),
                                   lambda b, si: (b, si, 0)),
        ),
        compiler_params=pltpu.CompilerParams(
            dimension_semantics=("parallel", "parallel"),
            vmem_limit_bytes=_VMEM_LIMIT_BYTES),
    )(x_bf, w_qkv, b_qkv)

    # --- 2) Attention over the hoisted Q/K/V slabs -------------------------
    kernel = functools.partial(_attention_kernel,
                               tq=TQ, seq_len=S, training=training)
    out_p = pl.pallas_call(
        kernel,
        out_shape=jax.ShapeDtypeStruct((B, S, Hp), jnp.bfloat16),
        grid_spec=pltpu.PrefetchScalarGridSpec(
            num_scalar_prefetch=0,
            grid=(B, S // TQ),
            in_specs=[
                pl.BlockSpec((pl.Squeezed(), 1, S), lambda b, qi: (b, 0, 0)),      # mask
                pl.BlockSpec((pl.Squeezed(), TQ, Hp), lambda b, qi: (b, qi, 0)),   # Q tile
                pl.BlockSpec((pl.Squeezed(), S, Hp), lambda b, qi: (b, 0, 1)),     # K (full S)
                pl.BlockSpec((pl.Squeezed(), S, Hp), lambda b, qi: (b, 0, 2)),     # V (full S)
            ],
            out_specs=pl.BlockSpec((pl.Squeezed(), TQ, Hp),
                                   lambda b, qi: (b, qi, 0)),
        ),
        compiler_params=pltpu.CompilerParams(
            dimension_semantics=("parallel", "parallel"),
            vmem_limit_bytes=_VMEM_LIMIT_BYTES),
    )(mask3, qkv, qkv, qkv)

    return out_p[:, :, :H]                 # drop lane padding (bf16 output)


def _reference(x, mask, wq, bq, wk, bk, wv, bv, training=True):
    q = x @ wq.T + bq
    k = x @ wk.T + bk
    v = x @ wv.T + bv
    H = wq.shape[0]
    s = q @ jnp.swapaxes(k, -1, -2) / np.sqrt(H)
    B, S, _ = s.shape
    tri = jnp.triu(jnp.ones((S, S), jnp.float32))
    temp_mask = tri[None, :, :] * mask[:, None, :]
    if training:
        s = jnp.where(temp_mask == 0.0, -1e22, s)
    p = jax.nn.softmax(s, axis=-1)
    return p @ v


if __name__ == "__main__":
    B, S = 2, 8
    embedding_dimension = 32
    head_dimension = 16

    key = jax.random.PRNGKey(0)
    kx, km, k1, k2, k3, k4, k5, k6 = jax.random.split(key, 8)

    x = jax.random.normal(kx, (B, S, embedding_dimension), dtype=jnp.float32)
    mask = jax.random.bernoulli(km, 0.7, (B, S)).astype(jnp.float32)

    # torch.nn.Linear-shaped parameters: W (H, E), b (H,)
    bound = 1.0 / np.sqrt(embedding_dimension)
    wq = jax.random.uniform(k1, (head_dimension, embedding_dimension), jnp.float32, -bound, bound)
    wk = jax.random.uniform(k2, (head_dimension, embedding_dimension), jnp.float32, -bound, bound)
    wv = jax.random.uniform(k3, (head_dimension, embedding_dimension), jnp.float32, -bound, bound)
    bq = jax.random.uniform(k4, (head_dimension,), jnp.float32, -bound, bound)
    bk = jax.random.uniform(k5, (head_dimension,), jnp.float32, -bound, bound)
    bv = jax.random.uniform(k6, (head_dimension,), jnp.float32, -bound, bound)

    out = self_attention(x, mask, wq, bq, wk, bk, wv, bv, training=True)
    out = jax.block_until_ready(out)

    ref = _reference(x, mask, wq, bq, wk, bk, wv, bv, training=True)
    # bf16 MXU math, bf16 output, approx reciprocal => loosened tolerance (the
    # reference module itself casts inputs to fp16 via @custom_fwd).
    np.testing.assert_allclose(np.asarray(out).astype(np.float32),
                               np.asarray(ref), rtol=3e-2, atol=3e-2)

    print("KERNEL_OK")
</pallas_src>

<mosaic_0001>
module attributes {stable_mosaic.version = 11 : i64} {
  func.func @_qkv_proj_kernel(%arg0: i32, %arg1: i32, %arg2: memref<1x8x32xbf16, #tpu.memory_space<vmem>>, %arg3: memref<32x384xbf16, #tpu.memory_space<vmem>>, %arg4: memref<1x384xf32, #tpu.memory_space<vmem>>, %arg5: memref<1x8x384xbf16, #tpu.memory_space<vmem>>) attributes {dimension_semantics = [#tpu.dimension_semantics<parallel>, #tpu.dimension_semantics<parallel>], iteration_bounds = array<i64: 2, 1>, scalar_prefetch = 0 : i64, scratch_operands = 0 : i64, tpu.core_type = #tpu.core_type<tc>, window_params = [{transform_indices = @transform_0, window_bounds = array<i64: 1, 8, 32>}, {pipeline_mode = #tpu.pipeline_mode<synchronous>, transform_indices = @transform_1, window_bounds = array<i64: 32, 384>}, {pipeline_mode = #tpu.pipeline_mode<synchronous>, transform_indices = @transform_2, window_bounds = array<i64: 1, 384>}, {transform_indices = @transform_3, window_bounds = array<i64: 1, 8, 384>}]} {
    %c0 = arith.constant 0 : index
    %c0_0 = arith.constant 0 : index
    %c0_1 = arith.constant 0 : index
    %0 = vector.load %arg2[%c0, %c0_0, %c0_1] : memref<1x8x32xbf16, #tpu.memory_space<vmem>>, vector<1x8x32xbf16>
    %1 = vector.shape_cast %0 : vector<1x8x32xbf16> to vector<8x32xbf16>
    %c0_2 = arith.constant 0 : index
    %c0_3 = arith.constant 0 : index
    %2 = vector.load %arg3[%c0_2, %c0_3] : memref<32x384xbf16, #tpu.memory_space<vmem>>, vector<32x384xbf16>
    %cst = arith.constant dense<0.000000e+00> : vector<8x384xf32>
    %3 = tpu.matmul %1, %2, %cst {dimension_numbers = #tpu.dot_dimension_numbers<[1], [0], [0], [1], [0, 0, 1, 1], [], []>} : vector<8x32xbf16>, vector<32x384xbf16>, vector<8x384xf32> -> vector<8x384xf32>
    %c0_4 = arith.constant 0 : index
    %c0_5 = arith.constant 0 : index
    %4 = vector.load %arg4[%c0_4, %c0_5] : memref<1x384xf32, #tpu.memory_space<vmem>>, vector<1x384xf32>
    %5 = vector.broadcast %4 : vector<1x384xf32> to vector<8x384xf32>
    %6 = arith.addf %3, %5 : vector<8x384xf32>
    %7 = arith.truncf %6 : vector<8x384xf32> to vector<8x384xbf16>
    %c0_6 = arith.constant 0 : index
    %c0_7 = arith.constant 0 : index
    %c0_8 = arith.constant 0 : index
    %8 = vector.load %arg5[%c0_6, %c0_7, %c0_8] : memref<1x8x384xbf16, #tpu.memory_space<vmem>>, vector<1x8x384xbf16>
    %9 = vector.shape_cast %8 : vector<1x8x384xbf16> to vector<8x384xbf16>
    %10 = vector.shape_cast %7 : vector<8x384xbf16> to vector<1x8x384xbf16>
    tpu.vector_store %arg5[%c0_6, %c0_7, %c0_8], %10 {strides = array<i32>} : memref<1x8x384xbf16, #tpu.memory_space<vmem>>, vector<1x8x384xbf16>,
    return
  }
  func.func @transform_0(%arg0: i32, %arg1: i32) -> (i32, i32, i32) {
    %c0_i32 = arith.constant 0 : i32
    %c0_i32_0 = arith.constant 0 : i32
    return %arg0, %arg1, %c0_i32 : i32, i32, i32
  }
  func.func @transform_1(%arg0: i32, %arg1: i32) -> (i32, i32) {
    %c0_i32 = arith.constant 0 : i32
    %c0_i32_0 = arith.constant 0 : i32
    %c0_i32_1 = arith.constant 0 : i32
    return %c0_i32, %c0_i32_0 : i32, i32
  }
  func.func @transform_2(%arg0: i32, %arg1: i32) -> (i32, i32) {
    %c0_i32 = arith.constant 0 : i32
    %c0_i32_0 = arith.constant 0 : i32
    %c0_i32_1 = arith.constant 0 : i32
    return %c0_i32, %c0_i32_0 : i32, i32
  }
  func.func @transform_3(%arg0: i32, %arg1: i32) -> (i32, i32, i32) {
    %c0_i32 = arith.constant 0 : i32
    %c0_i32_0 = arith.constant 0 : i32
    return %arg0, %arg1, %c0_i32 : i32, i32, i32
  }
}

</mosaic_0001>

<bundles_post_ra>
// kernel: tpu_custom_call.1
= control target key start
LH: loop header
LB: loop body
LE: loop exit
PB: predicated region body
PF: predicated region fallthrough
CT: control target
= control target key end

     0   :  { %8 = vsyncpa [#allocation3], 0  ;;  %s1002_s0 = inlined_call_operand.hbm [shape: bf16[2,8,32], index: 0, kind: input, shape index: {}]   ;;  %s1003_s1 = inlined_call_operand.hbm [shape: bf16[32,384], index: 1, kind: input, shape index: {}]   ;;  %s1004_s2 = inlined_call_operand.vmem [shape: f32[1,384], index: 2, kind: input, shape index: {}]   ;;  %s1005_s3 = inlined_call_operand.hbm [shape: bf16[2,8,384], index: 3, kind: output, shape index: {}]  }
   0x1   :  { %10 = vsyncpa [#allocation3 + $0x1], 0 }
   0x2   :  { %11 = vsyncpa [#allocation6], 0 }
   0x3   :  { %12 = vsyncpa [#allocation4], 0 }
   0x4   :  { %14 = vsyncpa [#allocation4 + $0x1], 0  ;;  %s784_s12 = smov 0   ;;  %s786_s13 = smov 0  }
   0x5   :  { %s788_s14 = smov 0   ;;  %s790_s15 = smov 0  }
   0x6   :  { %s792_s16 = smov 0   ;;  %s794_s17 = smov 0  }
   0x7 LB: > { %s486_s18 = sadd.s32 4294967295, %s754_s17   ;;  %s487_s19 = sadd.s32 4294967294, %s754_s17   ;;  %s754_s17 = sphi %s794_s17, %s20_s17   ;;  %s750_s16 = sphi %s792_s16, %s1029_s16   ;;  %s746_s15 = sphi %s790_s15, %s1028_s15   ;;  %s742_s14 = sphi %s788_s14, %s1027_s14   ;;  %s738_s13 = sphi %s786_s13, %s1026_s13   ;;  %s734_s12 = sphi %s784_s12, %s1025_s12  }
   0x8   : > { %p54_p0 = scmp.ne.s32.totalorder %s738_s13, %s734_s12  ;;  %p818_p1 = scmp.eq.s32.totalorder %s486_s18, 0 }
   0x9   : > { %p822_p2 = scmp.eq.s32.totalorder %s486_s18, 1  ;;  %p128_p3 = scmp.eq.s32.totalorder %s487_s19, 1 }
   0xa   : > { %s1010_s20 = scalar_select %p818_p1, 1, 0 }
   0xb   : > { %s1011_s21 = scalar_select %p822_p2, 1, 0 }
   0xc   : > { %p828_p4 = por %p818_p1, %p54_p0  ;;  %p488_p5 = scmp.ge.s32.totalorder %s754_s17, 1 }
   0xd   : > { %p833_p6 = por %p128_p3, %p54_p0  ;;  %p135_p7 = scmp.lt.s32.totalorder %s754_s17, 3 }
   0xe   : > { %s1012_s22 = scalar_select %p828_p4, 1, 0 }
   0xf   : > { %s1013_s23 = scalar_select %p833_p6, 1, 0 }
  0x10   : > { %p838_p8 = pnand %p488_p5, %p135_p7  ;;  %s756_s25 = smov [#allocation5]  }
  0x11   : > { %s147_s26 = sshll.u32 %s756_s25, 4  ;;  %s32_s28 = sadd.s32 1, %s750_s16  ;;  %s148_s26 = int_to_ptr.vmem [resolvable:$true] %s147_s26 }
  0x12   : > { %s1014_s24 = scalar_select %p838_p8, 1, 0 }
  0x13   : > { %p532_p9 = pneg %p838_p8  ;;  %s610_s4 = scalar_lea.hbm %s1003_s1, 768 }
  0x14   : > { %p611_p12 = scmp.ne.s32.totalorder %s1003_s1, %s610_s4  ;;  %p617_p5 = scmp.lt.u32.totalorder %s610_s4, %s1003_s1 }
  0x15   : > { %p847_p11 = pnand %p532_p9, %p818_p1 }
  0x17   : > { %p612_p13 = pneg %p847_p11 }
  0x19   : > { %p613_p0 = pnand %p612_p13, %p611_p12 }
  0x1b   : > { %p614_p3 = pneg %p613_p0 }
  0x1d   : > { %p619_p7 = pnand %p617_p5, %p614_p3 }
  0x1f   : > { %622 = shalt.err (!%p619_p7)
}
  0x20   : > { %s623_s9 = scalar_lea.vmem %s148_s26, 768  ;;  %p631_p1 = scmp.lt.s32.totalorder %s148_s26, %s148_s26 }
  0x21   : > { %p624_p9 = scmp.ne.s32.totalorder %s148_s26, %s623_s9  ;;  %p632_p4 = scmp.lt.s32.totalorder %s623_s9, %s623_s9 }
  0x23   : > { %p626_p10 = pnand %p624_p9, %p612_p13  ;;  %p633_p8 = por %p632_p4, %p631_p1 }
  0x25   : > { %p627_p6 = pneg %p626_p10 }
  0x27   : > { %p634_p2 = pnand %p633_p8, %p627_p6 }
  0x29   : > { %637 = shalt.err (!%p634_p2)
}
  0x2a   : > { %s757_s10 = smov 192   ;;  %s758_s11 = smov 12  }
  0x2b   : > { %535 = dma.hbm_to_vmem [thread:$0]  (!%p847_p11), %s1003_s1, 768, %s148_s26, [#allocation6], %s757_s10, %s757_s10, %s758_s11  }
  0x2c   : > { %p34_p1 = scmp.ge.s32.totalorder %s32_s28, 2  ;;  %s41_s25 = sadd.s32 1, %s742_s14 }
  0x2d   : > { %p48_p2 = scmp.ne.s32.totalorder %s742_s14, %s738_s13  ;;  %p49_p4 = scmp.eq.s32.totalorder %s754_s17, 0 }
  0x2e   : > { %s1031_s28 = smov (%p34_p1, %s32_s28), 0  ;;  %p1017_p8 = scmp.ne.s32.totalorder %s1011_s21, 0 }
  0x2f   : > { %p874_p6 = por %p49_p4, %p48_p2  ;;  %s36_s27 = ssub.s32 %s750_s16, %s1031_s28 }
  0x30   : > { %p880_p10 = por %p1017_p8, %p48_p2  ;;  %p545_p12 = scmp.lt.s32.totalorder %s754_s17, 2 }
  0x31   : > { %p39_p11 = scmp.eq.s32.totalorder %s36_s27, 0  ;;  %s164_s26 = sand.u32 1, %s742_s14  }
  0x32   : > { %s491_s4 = sshll.u32 %s164_s26, 2  ;;  %s492_s6 = sshll.u32 %s750_s16, 6 }
  0x33   : > { %s889_s5 = scalar_select %p39_p11, %s742_s14, %s41_s25  }
  0x34   : > { %s895_s9 = scalar_lea.hbm %s1002_s0, %s492_s6  ;;  %s168_s21 = scalar_lea.vmem [#allocation2], %s491_s4 }
  0x35   : > { %s176_s10 = sshll.u32 %s168_s21, 4  ;;  %p901_p13 = pnand %p545_p12, %p874_p6  ;;  %s897_s10 = int_to_ptr.vmem [resolvable:$true] %s176_s10 }
  0x36   : > { %s165_s18 = scalar_lea.sflag [#allocation3], %s164_s26  ;;  %s638_s19 = scalar_lea.hbm %s895_s9, 64 }
  0x37   : > { %p639_p0 = scmp.ne.s32.totalorder %s895_s9, %s638_s19  ;;  %p640_p3 = pneg %p901_p13 }
  0x38   : > { %s643_s4 = scalar_lea.hbm %s1002_s0, 128  ;;  %p644_p9 = scmp.lt.u32.totalorder %s895_s9, %s1002_s0 }
  0x39   : > { %p641_p5 = pnand %p640_p3, %p639_p0  ;;  %p645_p1 = scmp.lt.u32.totalorder %s643_s4, %s638_s19 }
  0x3a   : > { %p647_p4 = scmp.lt.u32.totalorder %s638_s19, %s895_s9 }
  0x3b   : > { %p642_p7 = pneg %p641_p5  ;;  %p646_p2 = por %p645_p1, %p644_p9 }
  0x3d   : > { %p648_p6 = por %p647_p4, %p646_p2 }
  0x3f   : > { %p649_p8 = pnand %p648_p6, %p642_p7 }
  0x41   : > { %652 = shalt.err (!%p649_p8)
}
  0x42   : > { %s653_s26 = scalar_lea.vmem %s897_s10, 64  ;;  %s759_s7 = smov [#allocation2]  }
  0x43   : > { %p654_p12 = scmp.ne.s32.totalorder %s897_s10, %s653_s26  ;;  %s658_s8 = sshll.u32 %s759_s7, 4  ;;  %s659_s8 = int_to_ptr.vmem [resolvable:$false] %s658_s8 }
  0x44   : > { %s660_s21 = scalar_lea.vmem %s659_s8, 128  ;;  %p661_p5 = scmp.lt.s32.totalorder %s897_s10, %s659_s8 }
  0x45   : > { %p656_p11 = pnand %p654_p12, %p640_p3  ;;  %p662_p9 = scmp.lt.s32.totalorder %s660_s21, %s653_s26 }
  0x47   : > { %p657_p0 = pneg %p656_p11  ;;  %p663_p1 = por %p662_p9, %p661_p5 }
  0x49   : > { %p664_p2 = pnand %p663_p1, %p657_p0 }
  0x4b   : > { %667 = shalt.err (!%p664_p2)
}
  0x4c   : > { %539 = dma.hbm_to_vmem [thread:$0]  (!%p901_p13), %s895_s9, 64, %s897_s10, %s165_s18  }
  0x4d   : > { %p1020_p7 = scmp.ne.s32.totalorder %s1014_s24, 0 }
  0x4e   : > { %s933_s19 = sand.u32 (!%p1020_p7), 1, %s738_s13   ;;  %p1021_p3 = scmp.ne.s32.totalorder (!%p1020_p7), %s1012_s22, 0 }
  0x4f   : > { %185 = sbr.rel (%p1020_p7) target bundleno = 331 (0x14b), region = 32  ;;  %s494_s25 = sshll.u32 (!%p1020_p7), %s933_s19, 2 }
  0x50   : > { %s188_s27 = scalar_lea.sflag (!%p1020_p7), [#allocation3], %s933_s19  ;;  %s191_s4 = scalar_lea.vmem (!%p1020_p7), [#allocation2], %s494_s25 }
  0x56   : > { %721 = dma.done.wait (%p1021_p3), %s188_s27, 64  }
  0x57   : > { %723 = vsyncadd (%p1021_p3), %s188_s27, 4294967232  ;;  %p1022_p4 = scmp.ne.s32.totalorder %s1010_s20, 0 }
  0x59   : > { %725 = dma.done.wait (%p1022_p4), [#allocation6], 768  }
  0x5a   : > { %727 = vsyncadd (%p1022_p4), [#allocation6], 4294966528  ;;  %v760_v0 = vmov 0.0   ;;  %vm761_vm0 = vmmov 0   ;;  %v762_v1 = vmov 0   ;;  %vm277_vm1 = vcmask 261120  }
  0x5b   : > { %514 = vmatprep.subr.bf16.mxu1 %v760_v0  ;;  %518 = vmatprep.mubr.msk.bf16.mxu1 %vm761_vm0, %v760_v0  ;;  %v602_v2 = vld [vmem:[#allocation5 + $0x4] ss:$12 sps:$4 sm:$0xff]   ;;  %v604_v3 = vld [vmem:[#allocation5 + $0x8] ss:$12 sps:$4 sm:$0xff]   ;;  %v605_v4 = vld [vmem:[#allocation5] ss:$12 sps:$4 sm:$0xff]   ;;  %v230_v9 = vlaneseq }
  0x5c   : > { %313 = vmatprep.mubr.bf16.mxu0 %v762_v1  ;;  %281 = vmatprep.subr.bf16.mxu0 %v602_v2  ;;  %v606_v5 = vld [vmem:[#allocation5 + $0x1c] ss:$12 sps:$4 sm:$0xff]   ;;  %v608_v6 = vld [vmem:[#allocation5 + $0x20] ss:$12 sps:$4 sm:$0xff]   ;;  %v609_v7 = vld [vmem:[#allocation5 + $0x18] ss:$12 sps:$4 sm:$0xff]  }
  0x5d   : > { %515 = vmatpush3.bf16.msra.mxu1 %v604_v3  ;;  %282 = vmatpush1.bf16.msra.mxu0 %v605_v4  ;;  %v219_v8 = vld [vmem:[%s191_s4] sm:$0xf]  ;;  %v231_v10 = vshrl.u32 %v230_v9, 7  ;;  %s522_s24 = smul.u32 12, %s933_s19  ;;  %s763_s7 = smov [#allocation7]  }
  0x5e   : > { %516 = vmatprep.subr.bf16.mxu1 %v760_v0  ;;  %283 = vmatprep.subr.bf16.mxu0 %v606_v5  ;;  %v228_v12 = vld [vmem:[%s1004_s2] sm:$0x7]  ;;  %s523_s9 = smul.u32 192, %s746_s15  ;;  %s378_s15 = scalar_lea.sflag [#allocation4], %s933_s19 }
  0x5f   : > { %v240_v11 = vsub.s32 2, %v231_v10  ;;  %v232_v13 = vsub.s32 0, %v231_v10  ;;  %v236_v14 = vsub.s32 1, %v231_v10  ;;  %s217_s10 = scalar_lea.vmem [#allocation7], %s522_s24  ;;  %s672_s8 = sshll.u32 %s763_s7, 4  ;;  %s673_s8 = int_to_ptr.vmem [resolvable:$false] %s672_s8 }
  0x60   : > { %s394_s11 = sshll.u32 %s217_s10, 4  ;;  %s953_s6 = scalar_lea.hbm %s1005_s3, %s523_s9  ;;  %s955_s11 = int_to_ptr.vmem [resolvable:$true] %s394_s11 }
  0x61   : > { %517 = vmatpush3.bf16.msra.mxu1 %v608_v6  ;;  %284 = vmatpush1.bf16.msra.mxu0 %v609_v7  ;;  %v241_v15 = vrot.slane %v228_v12, %v240_v11  ;;  %v233_v16 = vrot.slane %v228_v12, %v232_v13  ;;  %v237_v17 = vrot.slane %v228_v12, %v236_v14  ;;  %s668_s26 = scalar_lea.vmem %s955_s11, 192  ;;  %s674_s21 = scalar_lea.vmem %s673_s8, 384 }
  0x62   : > { %p669_p13 = scmp.ne.s32.totalorder %s955_s11, %s668_s26  ;;  %p675_p12 = scmp.lt.s32.totalorder %s955_s11, %s673_s8 }
  0x63   : > { %p676_p11 = scmp.lt.s32.totalorder %s674_s21, %s668_s26 }
  0x64   : > { %519 = vmatmul.mubr.msk.bf16.vlgmr.msra.gmra.mrb[0].mxu1 %vm277_vm1, %v219_v8  ;;  %502 = vmatmul.mubr.msk.bf16.vlgmr.msra.gmra.mrb[0].mxu0 %vm277_vm1, %v219_v8  ;;  %p670_p6 = pnand %p669_p13, %p880_p10 }
  0x65   : > { %p677_p0 = por %p676_p11, %p675_p12 }
  0x66   : > { %p671_p8 = pneg %p670_p6 }
  0x68   : > { %p678_p5 = pnand %p677_p0, %p671_p8 }
 0x137   : > { %v356_v18 = vpop.f32.mrb[0].mxu1  ;;  %v315_v20 = vpop.f32.mrb[0].mxu0 }
 0x138   : > { %v357_v19 = vadd.f32 %v356_v18, %v241_v15  ;;  %v520_v21 = vpop.f32.mrb[1].mxu1  ;;  %v316_v22 = vadd.f32 %v315_v20, %v233_v16  ;;  %v317_v23 = vpop.f32.mrb[1].mxu0 }
 0x139   : > { %v359_v24 = vpop.f32.mrb[2].mxu1  ;;  %v318_v26 = vadd.f32 %v317_v23, %v237_v17  ;;  %v319_v27 = vpop.f32.mrb[2].mxu0 }
 0x13a   : > { %v510_v25 = vpack.c.bf16 %v357_v19, %v357_v19  ;;  %v521_v28 = vpop.f32.mrb[3].mxu1  ;;  %v320_v29 = vpop.f32.mrb[3].mxu0 }
 0x13b   : > { %v509_v30 = vpack.c.bf16 %v318_v26, %v316_v22 }
 0x13c   : > { %376 = vst [vmem:[%s217_s10 + $0x8] sm:$0xf] %v510_v25 }
 0x13d   : > { %375 = vst [vmem:[%s217_s10] sm:$0xff] %v509_v30 }
 0x13e   : > { %681 = shalt.err (!%p678_p5)
}
 0x13f   : > { %s682_s19 = scalar_lea.hbm %s953_s6, 192  ;;  %s686_s4 = scalar_lea.hbm %s1005_s3, 384 }
 0x140   : > { %p683_p9 = scmp.ne.s32.totalorder %s953_s6, %s682_s19  ;;  %p687_p7 = scmp.lt.u32.totalorder %s953_s6, %s1005_s3 }
 0x141   : > { %p688_p3 = scmp.lt.u32.totalorder %s686_s4, %s682_s19  ;;  %p690_p13 = scmp.lt.u32.totalorder %s682_s19, %s953_s6 }
 0x142   : > { %p684_p1 = pnand %p683_p9, %p880_p10 }
 0x143   : > { %p689_p4 = por %p688_p3, %p687_p7 }
 0x144   : > { %p685_p2 = pneg %p684_p1 }
 0x145   : > { %p691_p6 = por %p690_p13, %p689_p4 }
 0x147   : > { %p692_p8 = pnand %p691_p6, %p685_p2 }
 0x149   : > { %695 = shalt.err (!%p692_p8)
}
 0x14a   : > { %530 = dma.vmem_to_hbm [thread:$0]  (%p880_p10), %s955_s11, 192, %s953_s6, %s378_s15  }
 0x14b PF: > { %s406_s24 = sand.u32 1, %s734_s12   ;;  %p1023_p12 = scmp.ne.s32.totalorder %s1013_s23, 0 }
 0x14c   : > { %p1024_p11 = scmp.ge.s32.totalorder %s754_s17, 2  ;;  %s407_s9 = scalar_lea.sflag [#allocation4], %s406_s24 }
 0x14e   : > { %p541_p0 = pnand %p1024_p11, %p1023_p12 }
 0x150   : > { %729 = dma.done.wait (!%p541_p0), %s407_s9, 192  }
 0x151   : > { %731 = vsyncadd (!%p541_p0), %s407_s9, 4294967104  ;;  %s20_s17 = sadd.s32 1, %s754_s17   ;;  %s1025_s12 = smov %s738_s13 }
 0x152   : > { %p17_p5 = scmp.ge.s32.totalorder %s20_s17, 4   ;;  %s1026_s13 = smov %s742_s14 }
 0x153   : > { %s1027_s14 = smov %s889_s5  ;;  %s1028_s15 = smov %s750_s16 }
 0x154   : > { %s1029_s16 = smov %s1031_s28  ;;  %19 = sbr.rel (!%p17_p5) target bundleno = 7 (0x7), region = 81 }
 0x15b   :  { %412 = vsyncpa [#allocation3], 1 }
 0x15c   :  { %414 = vsyncpa [#allocation3 + $0x1], 1 }
 0x15d   :  { %415 = vsyncpa [#allocation6], 1 }
 0x15e   :  { %416 = vsyncpa [#allocation4], 1 }
 0x15f   :  { %418 = vsyncpa [#allocation4 + $0x1], 1 }

</bundles_post_ra>
